<compile_context>
chip_gen: v6e
topology: v6e:2x2x1
jax: 0.10.0
libtpu: 0.0.40
codegen_flags: <defaults>
</compile_context>

<pallas_src>
import math

import jax
import jax.numpy as jnp
from jax.experimental import pallas as pl
from jax.experimental.pallas import tpu as pltpu

LANES = 128
_ROW_ALIGN = 32            # sublane tile safe for f32 / bf16 / int8 packing
_VMEM_BUDGET = 24 << 20    # double-buffered x/y/out working-set target (all gens)
_VMEM_LIMIT = 32 << 20     # explicit scoped-VMEM limit (v5e default is only 16 MiB)


def _add_kernel(x_ref, y_ref, o_ref):
    # Dtype promotion in-vreg: the VPU cast is free, the kernel is DMA-bound.
    o_ref[...] = x_ref[...].astype(o_ref.dtype) + y_ref[...].astype(o_ref.dtype)


def _add_scalar_kernel(s_ref, x_ref, o_ref):
    # s_ref: (1, 1) size-1 operand held in SMEM -> no broadcast copy in HBM.
    s = s_ref[0, 0].astype(o_ref.dtype)
    o_ref[...] = x_ref[...].astype(o_ref.dtype) + s


def _pick_width(total):
    """Largest lane-dense width (multiple of 128) that divides the flat size."""
    for c in (8192, 4096, 2048, 1024, 512, 256, 128):
        if total % c == 0:
            return c
    return None


def _pick_block_rows(rows, bytes_per_row):
    """Row tile as large as the VMEM budget allows; >=2 grid steps when possible."""
    max_rows = max(
        _ROW_ALIGN,
        (_VMEM_BUDGET // (2 * bytes_per_row)) // _ROW_ALIGN * _ROW_ALIGN,
    )
    if rows <= max_rows:
        # Whole array fits in one block.  Split it so the "parallel" grid axis
        # can engage both v7x TensorCores on mid-sized inputs.
        if rows >= 2 * _ROW_ALIGN:
            half = -(-rows // 2)                      # ceil(rows / 2)
            return -(-half // _ROW_ALIGN) * _ROW_ALIGN  # round up to 32
        return rows                                    # tiny: full-extent block
    return max_rows


def _launch_add(x2d, y2d, scalar, out_dtype):
    """Tiled elementwise add over a (rows, cols) slab.

    Exactly one of `y2d` (same-shape tensor) / `scalar` ((1,1) SMEM operand)
    is not None.
    """
    rows, cols = x2d.shape
    bytes_per_row = cols * (x2d.dtype.itemsize + jnp.dtype(out_dtype).itemsize)
    if y2d is not None:
        bytes_per_row += cols * y2d.dtype.itemsize
    block_rows = _pick_block_rows(rows, bytes_per_row)
    grid = (pl.cdiv(rows, block_rows),)
    tiled = pl.BlockSpec((block_rows, cols), lambda i: (i, 0))
    params = pltpu.CompilerParams(
        dimension_semantics=("parallel",),
        vmem_limit_bytes=_VMEM_LIMIT,
    )
    out_shape = jax.ShapeDtypeStruct((rows, cols), out_dtype)
    if y2d is None:
        return pl.pallas_call(
            _add_scalar_kernel,
            out_shape=out_shape,
            grid=grid,
            in_specs=[pl.BlockSpec(memory_space=pltpu.MemorySpace.SMEM), tiled],
            out_specs=tiled,
            compiler_params=params,
        )(scalar, x2d)
    return pl.pallas_call(
        _add_kernel,
        out_shape=out_shape,
        grid=grid,
        in_specs=[tiled, tiled],
        out_specs=tiled,
        compiler_params=params,
    )(x2d, y2d)


def _add_flat(x_flat, y_flat, scalar, total, out_dtype):
    """Flat add: wide lane-dense slab; ragged sizes split prefix + tail (no pad)."""
    cols = _pick_width(total)
    if cols is not None:
        y2d = None if y_flat is None else y_flat.reshape(total // cols, cols)
        out = _launch_add(x_flat.reshape(total // cols, cols), y2d, scalar, out_dtype)
        return out.reshape(total)

    # Rare ragged path: 128-aligned prefix through the wide kernel, <128-elem
    # tail as a full-extent (1, rem) block.  No jnp.pad double copy.
    aligned = (total // LANES) * LANES
    pieces = []
    if aligned:
        c = _pick_width(aligned)
        yp = None if y_flat is None else y_flat[:aligned].reshape(aligned // c, c)
        pieces.append(
            _launch_add(x_flat[:aligned].reshape(aligned // c, c), yp, scalar,
                        out_dtype).reshape(aligned))
    rem = total - aligned
    if rem:
        yt = None if y_flat is None else y_flat[aligned:].reshape(1, rem)
        pieces.append(
            _launch_add(x_flat[aligned:].reshape(1, rem), yt, scalar,
                        out_dtype).reshape(rem))
    return pieces[0] if len(pieces) == 1 else jnp.concatenate(pieces)


def _smem_scalar(v, out_dtype):
    """Size-1 operand -> (1,1) 32-bit-safe SMEM value (exact under promotion)."""
    s = v.reshape(1, 1).astype(out_dtype)
    if s.dtype.itemsize < 4:
        if jnp.issubdtype(out_dtype, jnp.floating):
            s = s.astype(jnp.float32)
        elif jnp.issubdtype(out_dtype, jnp.unsignedinteger):
            s = s.astype(jnp.uint32)
        else:
            s = s.astype(jnp.int32)
    return s


def pallas_sum(x, y):
    """Elementwise x + y with numpy broadcasting; hot paths run in Pallas."""
    x = jnp.asarray(x)
    y = jnp.asarray(y)
    out_shape = jnp.broadcast_shapes(x.shape, y.shape)
    out_dtype = jnp.promote_types(x.dtype, y.dtype)
    total = math.prod(out_shape)
    if total == 0:
        return jnp.zeros(out_shape, out_dtype)

    if y.size == 1 and x.size == total:
        out_flat = _add_flat(x.reshape(-1), None, _smem_scalar(y, out_dtype),
                             total, out_dtype)
    elif x.size == 1 and y.size == total:
        out_flat = _add_flat(y.reshape(-1), None, _smem_scalar(x, out_dtype),
                             total, out_dtype)
    else:
        # TODO(synk): general non-scalar broadcasting is still materialized by
        # XLA here (one extra HBM pass); doing it in-kernel needs per-pattern
        # BlockSpec index maps.
        if x.shape != out_shape:
            x = jnp.broadcast_to(x, out_shape)
        if y.shape != out_shape:
            y = jnp.broadcast_to(y, out_shape)
        out_flat = _add_flat(x.reshape(-1), y.reshape(-1), None, total, out_dtype)

    return out_flat.reshape(out_shape)


if __name__ == "__main__":
    key = jax.random.PRNGKey(0)
    kx, ky, ka, kb = jax.random.split(key, 4)

    # Small NCHW-ish inputs consistent with the module's forward(x, y).
    x = jax.random.normal(kx, (2, 4, 16, 16), dtype=jnp.float32)
    y = jax.random.normal(ky, (2, 4, 16, 16), dtype=jnp.float32)
    out = pallas_sum(x, y)
    jax.block_until_ready(out)
    ref = x + y
    assert out.shape == ref.shape and out.dtype == ref.dtype
    assert jnp.allclose(out, ref, atol=1e-6, rtol=1e-6)

    # Mixed dtypes: promotion happens in-kernel (no XLA astype pre-pass).
    y_bf16 = y.astype(jnp.bfloat16)
    out_m = pallas_sum(x, y_bf16)
    jax.block_until_ready(out_m)
    ref_m = x + y_bf16
    assert out_m.dtype == ref_m.dtype
    assert jnp.allclose(out_m, ref_m, atol=1e-5, rtol=1e-5)

    # Ragged flat size: 128-aligned prefix + short tail (no pad copies).
    a = jax.random.normal(ka, (2, 3, 5, 7), dtype=jnp.float32)
    b = jax.random.normal(kb, (2, 3, 5, 7), dtype=jnp.float32)
    out_r = pallas_sum(a, b)
    jax.block_until_ready(out_r)
    assert jnp.allclose(out_r, a + b, atol=1e-6, rtol=1e-6)

    # Scalar broadcast: size-1 operand rides in SMEM.
    s = jnp.float32(1.25)
    out_s = pallas_sum(x, s)
    jax.block_until_ready(out_s)
    assert jnp.allclose(out_s, x + s, atol=1e-6, rtol=1e-6)

    print("KERNEL_OK")
</pallas_src>

<mosaic_0001>
module attributes {stable_mosaic.version = 11 : i64} {
  func.func @_add_kernel(%arg0: i32, %arg1: memref<1x2048xf32, #tpu.memory_space<vmem>>, %arg2: memref<1x2048xf32, #tpu.memory_space<vmem>>, %arg3: memref<1x2048xf32, #tpu.memory_space<vmem>>) attributes {dimension_semantics = [#tpu.dimension_semantics<parallel>], iteration_bounds = array<i64: 1>, scalar_prefetch = 0 : i64, scratch_operands = 0 : i64, tpu.core_type = #tpu.core_type<tc>, window_params = [{transform_indices = @transform_0, window_bounds = array<i64: 1, 2048>}, {transform_indices = @transform_1, window_bounds = array<i64: 1, 2048>}, {transform_indices = @transform_2, window_bounds = array<i64: 1, 2048>}]} {
    %c0 = arith.constant 0 : index
    %c0_0 = arith.constant 0 : index
    %0 = vector.load %arg1[%c0, %c0_0] : memref<1x2048xf32, #tpu.memory_space<vmem>>, vector<1x2048xf32>
    %c0_1 = arith.constant 0 : index
    %c0_2 = arith.constant 0 : index
    %1 = vector.load %arg2[%c0_1, %c0_2] : memref<1x2048xf32, #tpu.memory_space<vmem>>, vector<1x2048xf32>
    %2 = arith.addf %0, %1 : vector<1x2048xf32>
    %c0_3 = arith.constant 0 : index
    %c0_4 = arith.constant 0 : index
    %3 = vector.load %arg3[%c0_3, %c0_4] : memref<1x2048xf32, #tpu.memory_space<vmem>>, vector<1x2048xf32>
    tpu.vector_store %arg3[%c0_3, %c0_4], %2 {strides = array<i32>} : memref<1x2048xf32, #tpu.memory_space<vmem>>, vector<1x2048xf32>,
    return
  }
  func.func @transform_0(%arg0: i32) -> (i32, i32) {
    %c0_i32 = arith.constant 0 : i32
    %c0_i32_0 = arith.constant 0 : i32
    return %arg0, %c0_i32 : i32, i32
  }
  func.func @transform_1(%arg0: i32) -> (i32, i32) {
    %c0_i32 = arith.constant 0 : i32
    %c0_i32_0 = arith.constant 0 : i32
    return %arg0, %c0_i32 : i32, i32
  }
  func.func @transform_2(%arg0: i32) -> (i32, i32) {
    %c0_i32 = arith.constant 0 : i32
    %c0_i32_0 = arith.constant 0 : i32
    return %arg0, %c0_i32 : i32, i32
  }
}

</mosaic_0001>

<bundles_post_ra>
// kernel: tpu_custom_call.1
= control target key start
LH: loop header
LB: loop body
LE: loop exit
PB: predicated region body
PF: predicated region fallthrough
CT: control target
= control target key end

     0   :  { %7 = vsyncpa [#allocation3], 0  ;;  %s156_s0 = inlined_call_operand.hbm [shape: f32[1,2048], index: 0, kind: input, shape index: {}]   ;;  %s157_s1 = inlined_call_operand.hbm [shape: f32[1,2048], index: 1, kind: input, shape index: {}]   ;;  %s158_s2 = inlined_call_operand.hbm [shape: f32[1,2048], index: 2, kind: output, shape index: {}]  }
   0x1   :  { %8 = vsyncpa [#allocation6], 0 }
   0x2   :  { %9 = vsyncpa [#allocation4], 0  ;;  %s129_s9 = smov [#allocation2]   ;;  %s130_s11 = smov [#allocation5]  }
   0x3   :  { %s16_s10 = sshll.u32 %s129_s9, 4  ;;  %s26_s12 = sshll.u32 %s130_s11, 4  ;;  %s17_s10 = int_to_ptr.vmem [resolvable:$true] %s16_s10  ;;  %s27_s12 = int_to_ptr.vmem [resolvable:$true] %s26_s12 }
   0x4   :  { %s71_s13 = scalar_lea.vmem %s17_s10, 256  ;;  %p76_p1 = scmp.lt.s32.totalorder %s17_s10, %s17_s10 }
   0x5   :  { %p72_p0 = scmp.ne.s32.totalorder %s17_s10, %s71_s13  ;;  %p77_p2 = scmp.lt.s32.totalorder %s71_s13, %s71_s13 }
   0x7   :  { %p78_p3 = por %p77_p2, %p76_p1 }
   0x9   :  { %p79_p4 = pnand %p78_p3, %p72_p0 }
   0xb   :  { %82 = shalt.err (!%p79_p4)
}
   0xc   :  { %19 = dma.hbm_to_vmem [thread:$0]  %s156_s0, 256, %s17_s10, [#allocation3]  }
   0xd   :  { %s91_s16 = scalar_lea.vmem %s27_s12, 256  ;;  %p96_p6 = scmp.lt.s32.totalorder %s27_s12, %s27_s12 }
   0xe   :  { %p92_p5 = scmp.ne.s32.totalorder %s27_s12, %s91_s16  ;;  %p97_p7 = scmp.lt.s32.totalorder %s91_s16, %s91_s16 }
  0x10   :  { %p98_p8 = por %p97_p7, %p96_p6 }
  0x12   :  { %p99_p9 = pnand %p98_p8, %p92_p5 }
  0x14   :  { %102 = shalt.err (!%p99_p9)
}
  0x15   :  { %29 = dma.hbm_to_vmem [thread:$0]  %s157_s1, 256, %s27_s12, [#allocation6]  }
  0x16   :  { %123 = dma.done.wait [#allocation3], 256  }
  0x17   :  { %124 = vsyncadd [#allocation3], 4294967040 }
  0x18   :  { %125 = dma.done.wait [#allocation6], 256  }
  0x19   :  { %126 = vsyncadd [#allocation6], 4294967040  ;;  %s131_s19 = smov [#allocation7]   ;;  %v36_v0 = vld [vmem:[#allocation2] sm:$0xff]  ;;  %v38_v1 = vld [vmem:[#allocation5] sm:$0xff] }
  0x1a   :  { %s50_s20 = sshll.u32 %s131_s19, 4  ;;  %v37_v2 = vld [vmem:[#allocation2 + $0x8] sm:$0xff]  ;;  %v40_v3 = vadd.f32 %v38_v1, %v36_v0  ;;  %v39_v4 = vld [vmem:[#allocation5 + $0x8] sm:$0xff]  ;;  %s51_s20 = int_to_ptr.vmem [resolvable:$true] %s50_s20 }
  0x1b   :  { %v41_v5 = vadd.f32 %v39_v4, %v37_v2  ;;  %s103_s0 = scalar_lea.vmem %s51_s20, 256  ;;  %p108_p11 = scmp.lt.s32.totalorder %s51_s20, %s51_s20 }
  0x1c   :  { %42 = vst [vmem:[#allocation7] sm:$0xff] %v40_v3  ;;  %p104_p10 = scmp.ne.s32.totalorder %s51_s20, %s103_s0  ;;  %p109_p12 = scmp.lt.s32.totalorder %s103_s0, %s103_s0 }
  0x1d   :  { %43 = vst [vmem:[#allocation7 + $0x8] sm:$0xff] %v41_v5 }
  0x1e   :  { %p110_p13 = por %p109_p12, %p108_p11 }
  0x20   :  { %p111_p0 = pnand %p110_p13, %p104_p10 }
  0x22   :  { %114 = shalt.err (!%p111_p0)
}
  0x23   :  { %53 = dma.vmem_to_hbm [thread:$0]  %s51_s20, 256, %s158_s2, [#allocation4]  }
  0x24   :  { %127 = dma.done.wait [#allocation4], 256  }
  0x25   :  { %128 = vsyncadd [#allocation4], 4294967040 }
  0x26   :  { %57 = vsyncpa [#allocation3], 1 }
  0x27   :  { %58 = vsyncpa [#allocation6], 1 }
  0x28   :  { %59 = vsyncpa [#allocation4], 1 }

</bundles_post_ra>
